<compile_context>
chip_gen: v6e
topology: v6e:2x2x1
jax: 0.10.0
libtpu: 0.0.40
codegen_flags: <defaults>
</compile_context>

<pallas_src>
import functools

import jax
import jax.numpy as jnp
import numpy as np
from jax.experimental import pallas as pl
from jax.experimental.pallas import tpu as pltpu

LEAKY_SLOPE = 0.01  # PyTorch nn.LeakyReLU default negative_slope

# TODO(synk): set to jnp.bfloat16 on v6e/v7x (halves VMEM/HBM bytes, doubles
# MXU rate; dots keep f32 accumulation); kept f32 for parity with PyTorch.
COMPUTE_DTYPE = jnp.float32


# ----------------------------------------------------------------------------
# Fused Pallas kernel: concat -> conv3x3+LeakyReLU -> conv3x3+LeakyReLU
# ----------------------------------------------------------------------------
def _up_double_conv_kernel(x2_ref, x1_ref, masks_ref, w1_ref, b1_ref,
                           w2_ref, b2_ref, o_ref, xbuf, hbuf, *, W):
    # x2_ref    : (1, C2,  HW)      skip-connection tile (channels on sublane)
    # x1_ref    : (1, C1,  HW)      upsampled (+diff-padded) tile
    # masks_ref : (2, HW)           row0 zeroes col x==0, row1 zeroes x==W-1
    # w1_ref    : (9, Cout, Cin)    conv1 weights, tap-major (t = dy*3+dx)
    # b1_ref    : (Cout, 1)
    # w2_ref    : (9, Cout, Cout)
    # b2_ref    : (Cout, 1)
    # o_ref     : (1, Cout, HW)     lane-dense NC(HW) output
    # xbuf      : VMEM (Cin,  (H+2)*W + 2)  row-padded flattened input (concat)
    # hbuf      : VMEM (Cout, (H+2)*W + 2)  row-padded conv1 activation
    Cout, HW = o_ref.shape[1], o_ref.shape[2]
    C2, C1 = x2_ref.shape[1], x1_ref.shape[1]
    Cin = C2 + C1
    base = W + 1                       # data starts at this lane offset

    mask_l = masks_ref[0:1, :]         # (1, HW)
    mask_r = masks_ref[1:2, :]

    def conv3x3_lrelu(buf_ref, w_ref, b_ref):
        # 9 per-tap MXU matmuls (Cout, C) x (C, HW), f32 accumulation.
        # Tap (dy, dx) for output pixel o = y*W + x lives at buffer lane
        # base + o + (dy-1)*W + (dx-1) = o + dy*W + dx  -> a static lane slice.
        acc = jnp.zeros((w_ref.shape[1], HW), jnp.float32)
        for dy in range(3):
            for dx in range(3):
                st = dy * W + dx
                slab = buf_ref[:, st:st + HW]          # (C, HW)
                if dx == 0:
                    slab = slab * mask_l   # left tap wraps to prev row's last col
                elif dx == 2:
                    slab = slab * mask_r   # right tap wraps to next row's first col
                acc = acc + jnp.dot(w_ref[dy * 3 + dx], slab,
                                    preferred_element_type=jnp.float32)
        acc = acc + b_ref[...]                         # (Cout, 1) lane-broadcast
        return jnp.where(acc >= 0, acc, LEAKY_SLOPE * acc)

    # Zero only the halo bands; the interior is fully overwritten every step
    # (stays correct when the batch axis is sharded across TensorCores).
    xbuf[:, 0:base] = jnp.zeros((Cin, base), xbuf.dtype)
    xbuf[:, base + HW:] = jnp.zeros((Cin, base), xbuf.dtype)
    # Channel "concat" [x2, x1] is just two interior writes into VMEM.
    xbuf[0:C2, base:base + HW] = x2_ref[0].astype(xbuf.dtype)
    xbuf[C2:Cin, base:base + HW] = x1_ref[0].astype(xbuf.dtype)

    h = conv3x3_lrelu(xbuf, w1_ref, b1_ref)

    # Inter-conv activation never leaves VMEM.
    hbuf[:, 0:base] = jnp.zeros((Cout, base), hbuf.dtype)
    hbuf[:, base + HW:] = jnp.zeros((Cout, base), hbuf.dtype)
    hbuf[:, base:base + HW] = h.astype(hbuf.dtype)

    y = conv3x3_lrelu(hbuf, w2_ref, b2_ref)

    # Lane-dense store: (Cout, HW) with HW=256 full lanes, no masked vst.
    o_ref[0] = y.astype(o_ref.dtype)


def double_conv_leakyrelu(x2_flat, x1_flat, H, W, w1, b1, w2, b2):
    """Fused concat -> conv3x3+LReLU -> conv3x3+LReLU.

    x2_flat: (N, C2, H*W), x1_flat: (N, C1, H*W)   (NCHW with HW flattened)
    w1: (Cout, C2+C1, 3, 3), w2: (Cout, Cout, 3, 3)  (PyTorch Conv2d layout)
    Returns (N, Cout, H*W)."""
    N, C2, HW = x2_flat.shape
    C1 = x1_flat.shape[1]
    assert x1_flat.shape == (N, C1, HW) and HW == H * W
    Cin = C2 + C1
    Cout = w1.shape[0]
    assert w1.shape == (Cout, Cin, 3, 3) and w2.shape == (Cout, Cout, 3, 3)

    cd = COMPUTE_DTYPE
    # (Cout, Cin, kh, kw) -> (9, Cout, Cin), tap index t = dy*3 + dx.
    w1p = jnp.transpose(w1, (2, 3, 0, 1)).reshape(9, Cout, Cin).astype(cd)
    w2p = jnp.transpose(w2, (2, 3, 0, 1)).reshape(9, Cout, Cout).astype(cd)
    b1r = b1.reshape(Cout, 1).astype(jnp.float32)
    b2r = b2.reshape(Cout, 1).astype(jnp.float32)

    # Column masks guarding the flattened-row wraparound of the dx=0/dx=2 taps.
    col = jnp.arange(HW, dtype=jnp.int32) % W
    masks = jnp.stack([(col != 0), (col != W - 1)], axis=0).astype(cd)   # (2, HW)

    B = (H + 2) * W + 2   # row-padded flattened buffer width

    # TODO(synk): for large feature maps add an H-row grid axis (1-row halo) and
    # budget VMEM against v7x's 64 MiB; at these sizes one image/step is fine.
    return pl.pallas_call(
        functools.partial(_up_double_conv_kernel, W=W),
        out_shape=jax.ShapeDtypeStruct((N, Cout, HW), x2_flat.dtype),
        grid=(N,),
        in_specs=[
            pl.BlockSpec((1, C2, HW), lambda n: (n, 0, 0)),
            pl.BlockSpec((1, C1, HW), lambda n: (n, 0, 0)),
            pl.BlockSpec((2, HW), lambda n: (0, 0)),
            pl.BlockSpec((9, Cout, Cin), lambda n: (0, 0, 0)),
            pl.BlockSpec((Cout, 1), lambda n: (0, 0)),
            pl.BlockSpec((9, Cout, Cout), lambda n: (0, 0, 0)),
            pl.BlockSpec((Cout, 1), lambda n: (0, 0)),
        ],
        out_specs=pl.BlockSpec((1, Cout, HW), lambda n: (n, 0, 0)),
        scratch_shapes=[
            pltpu.VMEM((Cin, B), cd),
            pltpu.VMEM((Cout, B), cd),
        ],
        compiler_params=pltpu.CompilerParams(
            dimension_semantics=("parallel",)),
    )(x2_flat.astype(cd), x1_flat.astype(cd), masks, w1p, b1r, w2p, b2r)


# ----------------------------------------------------------------------------
# Plain-JAX glue: bilinear upsample (align_corners=True) and diff-pad, in NCHW
# ----------------------------------------------------------------------------
def bilinear_upsample_x2_align_corners(x):
    """x: (N,C,H,W) -> (N,C,2H,2W); matches nn.Upsample(scale_factor=2,
    mode='bilinear', align_corners=True)."""
    N, C, H, W = x.shape
    Ho, Wo = 2 * H, 2 * W

    def coords(size_in, size_out):
        if size_in == 1:
            src = jnp.zeros((size_out,), jnp.float32)
        else:
            src = jnp.arange(size_out, dtype=jnp.float32) * (
                (size_in - 1) / (size_out - 1))
        i0 = jnp.floor(src).astype(jnp.int32)
        i1 = jnp.minimum(i0 + 1, size_in - 1)
        return i0, i1, src - i0.astype(jnp.float32)

    y0, y1, wy = coords(H, Ho)
    c0, c1, wx = coords(W, Wo)

    top = x[:, :, y0, :]
    bot = x[:, :, y1, :]
    rows = top * (1.0 - wy)[None, None, :, None] + bot * wy[None, None, :, None]
    left = rows[:, :, :, c0]
    right = rows[:, :, :, c1]
    out = left * (1.0 - wx) + right * wx
    return out.astype(x.dtype)


def up_forward(x1_nchw, x2_nchw, params):
    """Forward pass of `up` (bilinear=True). Inputs/outputs are NCHW."""
    N, C2, H2, W2 = x2_nchw.shape
    # TODO(synk): the upsample + diff-pad could also be folded into the Pallas
    # kernel (static 4-tap lerp while filling xbuf) to cut the x1_up HBM
    # round-trip; kept as cheap XLA glue here.
    x1 = bilinear_upsample_x2_align_corners(x1_nchw)
    diffY = H2 - x1.shape[2]
    diffX = W2 - x1.shape[3]
    assert diffY >= 0 and diffX >= 0, "negative diff (cropping) not supported"
    if diffY or diffX:
        x1 = jnp.pad(x1, ((0, 0), (0, 0),
                          (diffY // 2, diffY - diffY // 2),
                          (diffX // 2, diffX - diffX // 2)))
    C1 = x1.shape[1]
    Cout = params["w1"].shape[0]

    # Flatten spatial dims (free reshape of contiguous NCHW): gives the kernel
    # a lane-dense H*W axis with channels on sublanes — no transposes needed.
    x2f = x2_nchw.reshape(N, C2, H2 * W2)
    x1f = x1.reshape(N, C1, H2 * W2)

    y = double_conv_leakyrelu(x2f, x1f, H2, W2,
                              params["w1"], params["b1"],
                              params["w2"], params["b2"])
    return y.reshape(N, Cout, H2, W2)      # free reshape back to NCHW


# ----------------------------------------------------------------------------
# Parameters (PyTorch Conv2d layout) and a pure-JAX reference for validation
# ----------------------------------------------------------------------------
def init_params(in_ch, out_ch, key):
    """Weights in PyTorch Conv2d layout (Cout, Cin, kh, kw)."""
    k1, k2, k3, k4 = jax.random.split(key, 4)
    w1 = jax.random.normal(k1, (out_ch, in_ch, 3, 3), jnp.float32) * 0.1
    b1 = jax.random.normal(k2, (out_ch,), jnp.float32) * 0.1
    w2 = jax.random.normal(k3, (out_ch, out_ch, 3, 3), jnp.float32) * 0.1
    b2 = jax.random.normal(k4, (out_ch,), jnp.float32) * 0.1
    return {"w1": w1, "b1": b1, "w2": w2, "b2": b2}


def _conv3x3_ref(x, w, b):
    N, C, H, W = x.shape
    xp = jnp.pad(x, ((0, 0), (0, 0), (1, 1), (1, 1)))
    out = jnp.zeros((N, w.shape[0], H, W), jnp.float32)
    for dy in range(3):
        for dx in range(3):
            out = out + jnp.einsum("nchw,oc->nohw",
                                   xp[:, :, dy:dy + H, dx:dx + W],
                                   w[:, :, dy, dx],
                                   precision=jax.lax.Precision.HIGHEST)
    return out + b[None, :, None, None]


def up_forward_reference(x1_nchw, x2_nchw, params):
    x1 = bilinear_upsample_x2_align_corners(x1_nchw)
    diffY = x2_nchw.shape[2] - x1.shape[2]
    diffX = x2_nchw.shape[3] - x1.shape[3]
    x1 = jnp.pad(x1, ((0, 0), (0, 0),
                      (diffY // 2, diffY - diffY // 2),
                      (diffX // 2, diffX - diffX // 2)))
    x = jnp.concatenate([x2_nchw, x1], axis=1)
    h = _conv3x3_ref(x, params["w1"], params["b1"])
    h = jnp.where(h >= 0, h, LEAKY_SLOPE * h)
    y = _conv3x3_ref(h, params["w2"], params["b2"])
    return jnp.where(y >= 0, y, LEAKY_SLOPE * y)


if __name__ == "__main__":
    in_ch, out_ch = 8, 4          # up(in_ch=8, out_ch=4, bilinear=True)
    N = 2
    H1, W1 = 8, 8                 # x1 spatial (lower-resolution feature map)
    H2, W2 = 16, 16               # x2 spatial (skip connection)

    key = jax.random.PRNGKey(0)
    k_x1, k_x2 = jax.random.split(key)
    # x1 has in_ch//2 channels, x2 has in_ch//2 channels (concat -> in_ch)
    x1 = jax.random.normal(k_x1, (N, in_ch // 2, H1, W1), jnp.float32)  # NCHW
    x2 = jax.random.normal(k_x2, (N, in_ch // 2, H2, W2), jnp.float32)  # NCHW

    params = init_params(in_ch, out_ch, jax.random.PRNGKey(42))

    fwd = jax.jit(up_forward)
    out = jax.block_until_ready(fwd(x1, x2, params))
    assert out.shape == (N, out_ch, H2, W2), out.shape

    ref = jax.block_until_ready(jax.jit(up_forward_reference)(x1, x2, params))
    np.testing.assert_allclose(np.asarray(out), np.asarray(ref),
                               rtol=2e-3, atol=2e-3)
    print("KERNEL_OK")
</pallas_src>

<mosaic_0001>
module attributes {stable_mosaic.version = 11 : i64} {
  func.func @_up_double_conv_kernel(%arg0: i32, %arg1: memref<1x4x256xf32, #tpu.memory_space<vmem>>, %arg2: memref<1x4x256xf32, #tpu.memory_space<vmem>>, %arg3: memref<2x256xf32, #tpu.memory_space<vmem>>, %arg4: memref<9x4x8xf32, #tpu.memory_space<vmem>>, %arg5: memref<4x1xf32, #tpu.memory_space<vmem>>, %arg6: memref<9x4x4xf32, #tpu.memory_space<vmem>>, %arg7: memref<4x1xf32, #tpu.memory_space<vmem>>, %arg8: memref<1x4x256xf32, #tpu.memory_space<vmem>>, %arg9: memref<8x290xf32, #tpu.memory_space<vmem>>, %arg10: memref<4x290xf32, #tpu.memory_space<vmem>>) attributes {dimension_semantics = [#tpu.dimension_semantics<parallel>], iteration_bounds = array<i64: 2>, scalar_prefetch = 0 : i64, scratch_operands = 2 : i64, tpu.core_type = #tpu.core_type<tc>, window_params = [{transform_indices = @transform_0, window_bounds = array<i64: 1, 4, 256>}, {transform_indices = @transform_1, window_bounds = array<i64: 1, 4, 256>}, {pipeline_mode = #tpu.pipeline_mode<synchronous>, transform_indices = @transform_2, window_bounds = array<i64: 2, 256>}, {pipeline_mode = #tpu.pipeline_mode<synchronous>, transform_indices = @transform_3, window_bounds = array<i64: 9, 4, 8>}, {pipeline_mode = #tpu.pipeline_mode<synchronous>, transform_indices = @transform_4, window_bounds = array<i64: 4, 1>}, {pipeline_mode = #tpu.pipeline_mode<synchronous>, transform_indices = @transform_5, window_bounds = array<i64: 9, 4, 4>}, {pipeline_mode = #tpu.pipeline_mode<synchronous>, transform_indices = @transform_6, window_bounds = array<i64: 4, 1>}, {transform_indices = @transform_7, window_bounds = array<i64: 1, 4, 256>}]} {
    %c0 = arith.constant 0 : index
    %c0_0 = arith.constant 0 : index
    %0 = vector.load %arg3[%c0, %c0_0] : memref<2x256xf32, #tpu.memory_space<vmem>>, vector<1x256xf32>
    %c1 = arith.constant 1 : index
    %c0_1 = arith.constant 0 : index
    %1 = vector.load %arg3[%c1, %c0_1] : memref<2x256xf32, #tpu.memory_space<vmem>>, vector<1x256xf32>
    %cst = arith.constant 0.000000e+00 : f32
    %2 = vector.broadcast %cst : f32 to vector<8x17xf32>
    %c0_2 = arith.constant 0 : index
    %c0_3 = arith.constant 0 : index
    %3 = vector.load %arg9[%c0_2, %c0_3] : memref<8x290xf32, #tpu.memory_space<vmem>>, vector<8x17xf32>
    tpu.vector_store %arg9[%c0_2, %c0_3], %2 {strides = array<i32>} : memref<8x290xf32, #tpu.memory_space<vmem>>, vector<8x17xf32>,
    %cst_4 = arith.constant 0.000000e+00 : f32
    %4 = vector.broadcast %cst_4 : f32 to vector<8x17xf32>
    %c0_5 = arith.constant 0 : index
    %c273 = arith.constant 273 : index
    %5 = vector.load %arg9[%c0_5, %c273] : memref<8x290xf32, #tpu.memory_space<vmem>>, vector<8x17xf32>
    tpu.vector_store %arg9[%c0_5, %c273], %4 {strides = array<i32>} : memref<8x290xf32, #tpu.memory_space<vmem>>, vector<8x17xf32>,
    %c0_6 = arith.constant 0 : index
    %c0_7 = arith.constant 0 : index
    %c0_8 = arith.constant 0 : index
    %6 = vector.load %arg1[%c0_6, %c0_7, %c0_8] : memref<1x4x256xf32, #tpu.memory_space<vmem>>, vector<1x4x256xf32>
    %7 = vector.shape_cast %6 : vector<1x4x256xf32> to vector<4x256xf32>
    %c0_9 = arith.constant 0 : index
    %c17 = arith.constant 17 : index
    %8 = vector.load %arg9[%c0_9, %c17] : memref<8x290xf32, #tpu.memory_space<vmem>>, vector<4x256xf32>
    tpu.vector_store %arg9[%c0_9, %c17], %7 {strides = array<i32>} : memref<8x290xf32, #tpu.memory_space<vmem>>, vector<4x256xf32>,
    %c0_10 = arith.constant 0 : index
    %c0_11 = arith.constant 0 : index
    %c0_12 = arith.constant 0 : index
    %9 = vector.load %arg2[%c0_10, %c0_11, %c0_12] : memref<1x4x256xf32, #tpu.memory_space<vmem>>, vector<1x4x256xf32>
    %10 = vector.shape_cast %9 : vector<1x4x256xf32> to vector<4x256xf32>
    %c4 = arith.constant 4 : index
    %c17_13 = arith.constant 17 : index
    %11 = vector.load %arg9[%c4, %c17_13] : memref<8x290xf32, #tpu.memory_space<vmem>>, vector<4x256xf32>
    tpu.vector_store %arg9[%c4, %c17_13], %10 {strides = array<i32>} : memref<8x290xf32, #tpu.memory_space<vmem>>, vector<4x256xf32>,
    %cst_14 = arith.constant 0.000000e+00 : f32
    %12 = vector.broadcast %cst_14 : f32 to vector<4x256xf32>
    %c0_15 = arith.constant 0 : index
    %c0_16 = arith.constant 0 : index
    %13 = vector.load %arg9[%c0_15, %c0_16] : memref<8x290xf32, #tpu.memory_space<vmem>>, vector<8x256xf32>
    %14 = vector.broadcast %0 : vector<1x256xf32> to vector<8x256xf32>
    %15 = arith.mulf %13, %14 : vector<8x256xf32>
    %c0_17 = arith.constant 0 : index
    %c0_18 = arith.constant 0 : index
    %c0_19 = arith.constant 0 : index
    %16 = vector.load %arg4[%c0_17, %c0_18, %c0_19] : memref<9x4x8xf32, #tpu.memory_space<vmem>>, vector<1x4x8xf32>
    %17 = vector.shape_cast %16 : vector<1x4x8xf32> to vector<4x8xf32>
    %cst_20 = arith.constant dense<0.000000e+00> : vector<4x256xf32>
    %18 = tpu.matmul %17, %15, %cst_20 {dimension_numbers = #tpu.dot_dimension_numbers<[1], [0], [0], [1], [0, 0, 1, 1], [], []>} : vector<4x8xf32>, vector<8x256xf32>, vector<4x256xf32> -> vector<4x256xf32>
    %19 = arith.addf %12, %18 : vector<4x256xf32>
    %c0_21 = arith.constant 0 : index
    %c1_22 = arith.constant 1 : index
    %20 = vector.load %arg9[%c0_21, %c1_22] : memref<8x290xf32, #tpu.memory_space<vmem>>, vector<8x256xf32>
    %c1_23 = arith.constant 1 : index
    %c0_24 = arith.constant 0 : index
    %c0_25 = arith.constant 0 : index
    %21 = vector.load %arg4[%c1_23, %c0_24, %c0_25] : memref<9x4x8xf32, #tpu.memory_space<vmem>>, vector<1x4x8xf32>
    %22 = vector.shape_cast %21 : vector<1x4x8xf32> to vector<4x8xf32>
    %cst_26 = arith.constant dense<0.000000e+00> : vector<4x256xf32>
    %23 = tpu.matmul %22, %20, %cst_26 {dimension_numbers = #tpu.dot_dimension_numbers<[1], [0], [0], [1], [0, 0, 1, 1], [], []>} : vector<4x8xf32>, vector<8x256xf32>, vector<4x256xf32> -> vector<4x256xf32>
    %24 = arith.addf %19, %23 : vector<4x256xf32>
    %c0_27 = arith.constant 0 : index
    %c2 = arith.constant 2 : index
    %25 = vector.load %arg9[%c0_27, %c2] : memref<8x290xf32, #tpu.memory_space<vmem>>, vector<8x256xf32>
    %26 = vector.broadcast %1 : vector<1x256xf32> to vector<8x256xf32>
    %27 = arith.mulf %25, %26 : vector<8x256xf32>
    %c2_28 = arith.constant 2 : index
    %c0_29 = arith.constant 0 : index
    %c0_30 = arith.constant 0 : index
    %28 = vector.load %arg4[%c2_28, %c0_29, %c0_30] : memref<9x4x8xf32, #tpu.memory_space<vmem>>, vector<1x4x8xf32>
    %29 = vector.shape_cast %28 : vector<1x4x8xf32> to vector<4x8xf32>
    %cst_31 = arith.constant dense<0.000000e+00> : vector<4x256xf32>
    %30 = tpu.matmul %29, %27, %cst_31 {dimension_numbers = #tpu.dot_dimension_numbers<[1], [0], [0], [1], [0, 0, 1, 1], [], []>} : vector<4x8xf32>, vector<8x256xf32>, vector<4x256xf32> -> vector<4x256xf32>
    %31 = arith.addf %24, %30 : vector<4x256xf32>
    %c0_32 = arith.constant 0 : index
    %c16 = arith.constant 16 : index
    %32 = vector.load %arg9[%c0_32, %c16] : memref<8x290xf32, #tpu.memory_space<vmem>>, vector<8x256xf32>
    %33 = vector.broadcast %0 : vector<1x256xf32> to vector<8x256xf32>
    %34 = arith.mulf %32, %33 : vector<8x256xf32>
    %c3 = arith.constant 3 : index
    %c0_33 = arith.constant 0 : index
    %c0_34 = arith.constant 0 : index
    %35 = vector.load %arg4[%c3, %c0_33, %c0_34] : memref<9x4x8xf32, #tpu.memory_space<vmem>>, vector<1x4x8xf32>
    %36 = vector.shape_cast %35 : vector<1x4x8xf32> to vector<4x8xf32>
    %cst_35 = arith.constant dense<0.000000e+00> : vector<4x256xf32>
    %37 = tpu.matmul %36, %34, %cst_35 {dimension_numbers = #tpu.dot_dimension_numbers<[1], [0], [0], [1], [0, 0, 1, 1], [], []>} : vector<4x8xf32>, vector<8x256xf32>, vector<4x256xf32> -> vector<4x256xf32>
    %38 = arith.addf %31, %37 : vector<4x256xf32>
    %c0_36 = arith.constant 0 : index
    %c17_37 = arith.constant 17 : index
    %39 = vector.load %arg9[%c0_36, %c17_37] : memref<8x290xf32, #tpu.memory_space<vmem>>, vector<8x256xf32>
    %c4_38 = arith.constant 4 : index
    %c0_39 = arith.constant 0 : index
    %c0_40 = arith.constant 0 : index
    %40 = vector.load %arg4[%c4_38, %c0_39, %c0_40] : memref<9x4x8xf32, #tpu.memory_space<vmem>>, vector<1x4x8xf32>
    %41 = vector.shape_cast %40 : vector<1x4x8xf32> to vector<4x8xf32>
    %cst_41 = arith.constant dense<0.000000e+00> : vector<4x256xf32>
    %42 = tpu.matmul %41, %39, %cst_41 {dimension_numbers = #tpu.dot_dimension_numbers<[1], [0], [0], [1], [0, 0, 1, 1], [], []>} : vector<4x8xf32>, vector<8x256xf32>, vector<4x256xf32> -> vector<4x256xf32>
    %43 = arith.addf %38, %42 : vector<4x256xf32>
    %c0_42 = arith.constant 0 : index
    %c18 = arith.constant 18 : index
    %44 = vector.load %arg9[%c0_42, %c18] : memref<8x290xf32, #tpu.memory_space<vmem>>, vector<8x256xf32>
    %45 = vector.broadcast %1 : vector<1x256xf32> to vector<8x256xf32>
    %46 = arith.mulf %44, %45 : vector<8x256xf32>
    %c5 = arith.constant 5 : index
    %c0_43 = arith.constant 0 : index
    %c0_44 = arith.constant 0 : index
    %47 = vector.load %arg4[%c5, %c0_43, %c0_44] : memref<9x4x8xf32, #tpu.memory_space<vmem>>, vector<1x4x8xf32>
    %48 = vector.shape_cast %47 : vector<1x4x8xf32> to vector<4x8xf32>
    %cst_45 = arith.constant dense<0.000000e+00> : vector<4x256xf32>
    %49 = tpu.matmul %48, %46, %cst_45 {dimension_numbers = #tpu.dot_dimension_numbers<[1], [0], [0], [1], [0, 0, 1, 1], [], []>} : vector<4x8xf32>, vector<8x256xf32>, vector<4x256xf32> -> vector<4x256xf32>
    %50 = arith.addf %43, %49 : vector<4x256xf32>
    %c0_46 = arith.constant 0 : index
    %c32 = arith.constant 32 : index
    %51 = vector.load %arg9[%c0_46, %c32] : memref<8x290xf32, #tpu.memory_space<vmem>>, vector<8x256xf32>
    %52 = vector.broadcast %0 : vector<1x256xf32> to vector<8x256xf32>
    %53 = arith.mulf %51, %52 : vector<8x256xf32>
    %c6 = arith.constant 6 : index
    %c0_47 = arith.constant 0 : index
    %c0_48 = arith.constant 0 : index
    %54 = vector.load %arg4[%c6, %c0_47, %c0_48] : memref<9x4x8xf32, #tpu.memory_space<vmem>>, vector<1x4x8xf32>
    %55 = vector.shape_cast %54 : vector<1x4x8xf32> to vector<4x8xf32>
    %cst_49 = arith.constant dense<0.000000e+00> : vector<4x256xf32>
    %56 = tpu.matmul %55, %53, %cst_49 {dimension_numbers = #tpu.dot_dimension_numbers<[1], [0], [0], [1], [0, 0, 1, 1], [], []>} : vector<4x8xf32>, vector<8x256xf32>, vector<4x256xf32> -> vector<4x256xf32>
    %57 = arith.addf %50, %56 : vector<4x256xf32>
    %c0_50 = arith.constant 0 : index
    %c33 = arith.constant 33 : index
    %58 = vector.load %arg9[%c0_50, %c33] : memref<8x290xf32, #tpu.memory_space<vmem>>, vector<8x256xf32>
    %c7 = arith.constant 7 : index
    %c0_51 = arith.constant 0 : index
    %c0_52 = arith.constant 0 : index
    %59 = vector.load %arg4[%c7, %c0_51, %c0_52] : memref<9x4x8xf32, #tpu.memory_space<vmem>>, vector<1x4x8xf32>
    %60 = vector.shape_cast %59 : vector<1x4x8xf32> to vector<4x8xf32>
    %cst_53 = arith.constant dense<0.000000e+00> : vector<4x256xf32>
    %61 = tpu.matmul %60, %58, %cst_53 {dimension_numbers = #tpu.dot_dimension_numbers<[1], [0], [0], [1], [0, 0, 1, 1], [], []>} : vector<4x8xf32>, vector<8x256xf32>, vector<4x256xf32> -> vector<4x256xf32>
    %62 = arith.addf %57, %61 : vector<4x256xf32>
    %c0_54 = arith.constant 0 : index
    %c34 = arith.constant 34 : index
    %63 = vector.load %arg9[%c0_54, %c34] : memref<8x290xf32, #tpu.memory_space<vmem>>, vector<8x256xf32>
    %64 = vector.broadcast %1 : vector<1x256xf32> to vector<8x256xf32>
    %65 = arith.mulf %63, %64 : vector<8x256xf32>
    %c8 = arith.constant 8 : index
    %c0_55 = arith.constant 0 : index
    %c0_56 = arith.constant 0 : index
    %66 = vector.load %arg4[%c8, %c0_55, %c0_56] : memref<9x4x8xf32, #tpu.memory_space<vmem>>, vector<1x4x8xf32>
    %67 = vector.shape_cast %66 : vector<1x4x8xf32> to vector<4x8xf32>
    %cst_57 = arith.constant dense<0.000000e+00> : vector<4x256xf32>
    %68 = tpu.matmul %67, %65, %cst_57 {dimension_numbers = #tpu.dot_dimension_numbers<[1], [0], [0], [1], [0, 0, 1, 1], [], []>} : vector<4x8xf32>, vector<8x256xf32>, vector<4x256xf32> -> vector<4x256xf32>
    %69 = arith.addf %62, %68 : vector<4x256xf32>
    %c0_58 = arith.constant 0 : index
    %c0_59 = arith.constant 0 : index
    %70 = vector.load %arg5[%c0_58, %c0_59] : memref<4x1xf32, #tpu.memory_space<vmem>>, vector<4x1xf32>
    %71 = vector.broadcast %70 : vector<4x1xf32> to vector<4x256xf32>
    %72 = arith.addf %69, %71 : vector<4x256xf32>
    %cst_60 = arith.constant 0.000000e+00 : f32
    %73 = vector.broadcast %cst_60 : f32 to vector<4x256xf32>
    %74 = arith.cmpf oge, %72, %73 : vector<4x256xf32>
    %cst_61 = arith.constant 0.00999999977 : f32
    %75 = vector.broadcast %cst_61 : f32 to vector<4x256xf32>
    %76 = arith.mulf %75, %72 : vector<4x256xf32>
    %77 = arith.select %74, %72, %76 : vector<4x256xi1>, vector<4x256xf32>
    %cst_62 = arith.constant 0.000000e+00 : f32
    %78 = vector.broadcast %cst_62 : f32 to vector<4x17xf32>
    %c0_63 = arith.constant 0 : index
    %c0_64 = arith.constant 0 : index
    %79 = vector.load %arg10[%c0_63, %c0_64] : memref<4x290xf32, #tpu.memory_space<vmem>>, vector<4x17xf32>
    tpu.vector_store %arg10[%c0_63, %c0_64], %78 {strides = array<i32>} : memref<4x290xf32, #tpu.memory_space<vmem>>, vector<4x17xf32>,
    %cst_65 = arith.constant 0.000000e+00 : f32
    %80 = vector.broadcast %cst_65 : f32 to vector<4x17xf32>
    %c0_66 = arith.constant 0 : index
    %c273_67 = arith.constant 273 : index
    %81 = vector.load %arg10[%c0_66, %c273_67] : memref<4x290xf32, #tpu.memory_space<vmem>>, vector<4x17xf32>
    tpu.vector_store %arg10[%c0_66, %c273_67], %80 {strides = array<i32>} : memref<4x290xf32, #tpu.memory_space<vmem>>, vector<4x17xf32>,
    %c0_68 = arith.constant 0 : index
    %c17_69 = arith.constant 17 : index
    %82 = vector.load %arg10[%c0_68, %c17_69] : memref<4x290xf32, #tpu.memory_space<vmem>>, vector<4x256xf32>
    tpu.vector_store %arg10[%c0_68, %c17_69], %77 {strides = array<i32>} : memref<4x290xf32, #tpu.memory_space<vmem>>, vector<4x256xf32>,
    %cst_70 = arith.constant 0.000000e+00 : f32
    %83 = vector.broadcast %cst_70 : f32 to vector<4x256xf32>
    %c0_71 = arith.constant 0 : index
    %c0_72 = arith.constant 0 : index
    %84 = vector.load %arg10[%c0_71, %c0_72] : memref<4x290xf32, #tpu.memory_space<vmem>>, vector<4x256xf32>
    %85 = vector.broadcast %0 : vector<1x256xf32> to vector<4x256xf32>
    %86 = arith.mulf %84, %85 : vector<4x256xf32>
    %c0_73 = arith.constant 0 : index
    %c0_74 = arith.constant 0 : index
    %c0_75 = arith.constant 0 : index
    %87 = vector.load %arg6[%c0_73, %c0_74, %c0_75] : memref<9x4x4xf32, #tpu.memory_space<vmem>>, vector<1x4x4xf32>
    %88 = vector.shape_cast %87 : vector<1x4x4xf32> to vector<4x4xf32>
    %cst_76 = arith.constant dense<0.000000e+00> : vector<4x256xf32>
    %89 = tpu.matmul %88, %86, %cst_76 {dimension_numbers = #tpu.dot_dimension_numbers<[1], [0], [0], [1], [0, 0, 1, 1], [], []>} : vector<4x4xf32>, vector<4x256xf32>, vector<4x256xf32> -> vector<4x256xf32>
    %90 = arith.addf %83, %89 : vector<4x256xf32>
    %c0_77 = arith.constant 0 : index
    %c1_78 = arith.constant 1 : index
    %91 = vector.load %arg10[%c0_77, %c1_78] : memref<4x290xf32, #tpu.memory_space<vmem>>, vector<4x256xf32>
    %c1_79 = arith.constant 1 : index
    %c0_80 = arith.constant 0 : index
    %c0_81 = arith.constant 0 : index
    %92 = vector.load %arg6[%c1_79, %c0_80, %c0_81] : memref<9x4x4xf32, #tpu.memory_space<vmem>>, vector<1x4x4xf32>
    %93 = vector.shape_cast %92 : vector<1x4x4xf32> to vector<4x4xf32>
    %cst_82 = arith.constant dense<0.000000e+00> : vector<4x256xf32>
    %94 = tpu.matmul %93, %91, %cst_82 {dimension_numbers = #tpu.dot_dimension_numbers<[1], [0], [0], [1], [0, 0, 1, 1], [], []>} : vector<4x4xf32>, vector<4x256xf32>, vector<4x256xf32> -> vector<4x256xf32>
    %95 = arith.addf %90, %94 : vector<4x256xf32>
    %c0_83 = arith.constant 0 : index
    %c2_84 = arith.constant 2 : index
    %96 = vector.load %arg10[%c0_83, %c2_84] : memref<4x290xf32, #tpu.memory_space<vmem>>, vector<4x256xf32>
    %97 = vector.broadcast %1 : vector<1x256xf32> to vector<4x256xf32>
    %98 = arith.mulf %96, %97 : vector<4x256xf32>
    %c2_85 = arith.constant 2 : index
    %c0_86 = arith.constant 0 : index
    %c0_87 = arith.constant 0 : index
    %99 = vector.load %arg6[%c2_85, %c0_86, %c0_87] : memref<9x4x4xf32, #tpu.memory_space<vmem>>, vector<1x4x4xf32>
    %100 = vector.shape_cast %99 : vector<1x4x4xf32> to vector<4x4xf32>
    %cst_88 = arith.constant dense<0.000000e+00> : vector<4x256xf32>
    %101 = tpu.matmul %100, %98, %cst_88 {dimension_numbers = #tpu.dot_dimension_numbers<[1], [0], [0], [1], [0, 0, 1, 1], [], []>} : vector<4x4xf32>, vector<4x256xf32>, vector<4x256xf32> -> vector<4x256xf32>
    %102 = arith.addf %95, %101 : vector<4x256xf32>
    %c0_89 = arith.constant 0 : index
    %c16_90 = arith.constant 16 : index
    %103 = vector.load %arg10[%c0_89, %c16_90] : memref<4x290xf32, #tpu.memory_space<vmem>>, vector<4x256xf32>
    %104 = vector.broadcast %0 : vector<1x256xf32> to vector<4x256xf32>
    %105 = arith.mulf %103, %104 : vector<4x256xf32>
    %c3_91 = arith.constant 3 : index
    %c0_92 = arith.constant 0 : index
    %c0_93 = arith.constant 0 : index
    %106 = vector.load %arg6[%c3_91, %c0_92, %c0_93] : memref<9x4x4xf32, #tpu.memory_space<vmem>>, vector<1x4x4xf32>
    %107 = vector.shape_cast %106 : vector<1x4x4xf32> to vector<4x4xf32>
    %cst_94 = arith.constant dense<0.000000e+00> : vector<4x256xf32>
    %108 = tpu.matmul %107, %105, %cst_94 {dimension_numbers = #tpu.dot_dimension_numbers<[1], [0], [0], [1], [0, 0, 1, 1], [], []>} : vector<4x4xf32>, vector<4x256xf32>, vector<4x256xf32> -> vector<4x256xf32>
    %109 = arith.addf %102, %108 : vector<4x256xf32>
    %c0_95 = arith.constant 0 : index
    %c17_96 = arith.constant 17 : index
    %110 = vector.load %arg10[%c0_95, %c17_96] : memref<4x290xf32, #tpu.memory_space<vmem>>, vector<4x256xf32>
    %c4_97 = arith.constant 4 : index
    %c0_98 = arith.constant 0 : index
    %c0_99 = arith.constant 0 : index
    %111 = vector.load %arg6[%c4_97, %c0_98, %c0_99] : memref<9x4x4xf32, #tpu.memory_space<vmem>>, vector<1x4x4xf32>
    %112 = vector.shape_cast %111 : vector<1x4x4xf32> to vector<4x4xf32>
    %cst_100 = arith.constant dense<0.000000e+00> : vector<4x256xf32>
    %113 = tpu.matmul %112, %110, %cst_100 {dimension_numbers = #tpu.dot_dimension_numbers<[1], [0], [0], [1], [0, 0, 1, 1], [], []>} : vector<4x4xf32>, vector<4x256xf32>, vector<4x256xf32> -> vector<4x256xf32>
    %114 = arith.addf %109, %113 : vector<4x256xf32>
    %c0_101 = arith.constant 0 : index
    %c18_102 = arith.constant 18 : index
    %115 = vector.load %arg10[%c0_101, %c18_102] : memref<4x290xf32, #tpu.memory_space<vmem>>, vector<4x256xf32>
    %116 = vector.broadcast %1 : vector<1x256xf32> to vector<4x256xf32>
    %117 = arith.mulf %115, %116 : vector<4x256xf32>
    %c5_103 = arith.constant 5 : index
    %c0_104 = arith.constant 0 : index
    %c0_105 = arith.constant 0 : index
    %118 = vector.load %arg6[%c5_103, %c0_104, %c0_105] : memref<9x4x4xf32, #tpu.memory_space<vmem>>, vector<1x4x4xf32>
    %119 = vector.shape_cast %118 : vector<1x4x4xf32> to vector<4x4xf32>
    %cst_106 = arith.constant dense<0.000000e+00> : vector<4x256xf32>
    %120 = tpu.matmul %119, %117, %cst_106 {dimension_numbers = #tpu.dot_dimension_numbers<[1], [0], [0], [1], [0, 0, 1, 1], [], []>} : vector<4x4xf32>, vector<4x256xf32>, vector<4x256xf32> -> vector<4x256xf32>
    %121 = arith.addf %114, %120 : vector<4x256xf32>
    %c0_107 = arith.constant 0 : index
    %c32_108 = arith.constant 32 : index
    %122 = vector.load %arg10[%c0_107, %c32_108] : memref<4x290xf32, #tpu.memory_space<vmem>>, vector<4x256xf32>
    %123 = vector.broadcast %0 : vector<1x256xf32> to vector<4x256xf32>
    %124 = arith.mulf %122, %123 : vector<4x256xf32>
    %c6_109 = arith.constant 6 : index
    %c0_110 = arith.constant 0 : index
    %c0_111 = arith.constant 0 : index
    %125 = vector.load %arg6[%c6_109, %c0_110, %c0_111] : memref<9x4x4xf32, #tpu.memory_space<vmem>>, vector<1x4x4xf32>
    %126 = vector.shape_cast %125 : vector<1x4x4xf32> to vector<4x4xf32>
    %cst_112 = arith.constant dense<0.000000e+00> : vector<4x256xf32>
    %127 = tpu.matmul %126, %124, %cst_112 {dimension_numbers = #tpu.dot_dimension_numbers<[1], [0], [0], [1], [0, 0, 1, 1], [], []>} : vector<4x4xf32>, vector<4x256xf32>, vector<4x256xf32> -> vector<4x256xf32>
    %128 = arith.addf %121, %127 : vector<4x256xf32>
    %c0_113 = arith.constant 0 : index
    %c33_114 = arith.constant 33 : index
    %129 = vector.load %arg10[%c0_113, %c33_114] : memref<4x290xf32, #tpu.memory_space<vmem>>, vector<4x256xf32>
    %c7_115 = arith.constant 7 : index
    %c0_116 = arith.constant 0 : index
    %c0_117 = arith.constant 0 : index
    %130 = vector.load %arg6[%c7_115, %c0_116, %c0_117] : memref<9x4x4xf32, #tpu.memory_space<vmem>>, vector<1x4x4xf32>
    %131 = vector.shape_cast %130 : vector<1x4x4xf32> to vector<4x4xf32>
    %cst_118 = arith.constant dense<0.000000e+00> : vector<4x256xf32>
    %132 = tpu.matmul %131, %129, %cst_118 {dimension_numbers = #tpu.dot_dimension_numbers<[1], [0], [0], [1], [0, 0, 1, 1], [], []>} : vector<4x4xf32>, vector<4x256xf32>, vector<4x256xf32> -> vector<4x256xf32>
    %133 = arith.addf %128, %132 : vector<4x256xf32>
    %c0_119 = arith.constant 0 : index
    %c34_120 = arith.constant 34 : index
    %134 = vector.load %arg10[%c0_119, %c34_120] : memref<4x290xf32, #tpu.memory_space<vmem>>, vector<4x256xf32>
    %135 = vector.broadcast %1 : vector<1x256xf32> to vector<4x256xf32>
    %136 = arith.mulf %134, %135 : vector<4x256xf32>
    %c8_121 = arith.constant 8 : index
    %c0_122 = arith.constant 0 : index
    %c0_123 = arith.constant 0 : index
    %137 = vector.load %arg6[%c8_121, %c0_122, %c0_123] : memref<9x4x4xf32, #tpu.memory_space<vmem>>, vector<1x4x4xf32>
    %138 = vector.shape_cast %137 : vector<1x4x4xf32> to vector<4x4xf32>
    %cst_124 = arith.constant dense<0.000000e+00> : vector<4x256xf32>
    %139 = tpu.matmul %138, %136, %cst_124 {dimension_numbers = #tpu.dot_dimension_numbers<[1], [0], [0], [1], [0, 0, 1, 1], [], []>} : vector<4x4xf32>, vector<4x256xf32>, vector<4x256xf32> -> vector<4x256xf32>
    %140 = arith.addf %133, %139 : vector<4x256xf32>
    %c0_125 = arith.constant 0 : index
    %c0_126 = arith.constant 0 : index
    %141 = vector.load %arg7[%c0_125, %c0_126] : memref<4x1xf32, #tpu.memory_space<vmem>>, vector<4x1xf32>
    %142 = vector.broadcast %141 : vector<4x1xf32> to vector<4x256xf32>
    %143 = arith.addf %140, %142 : vector<4x256xf32>
    %cst_127 = arith.constant 0.000000e+00 : f32
    %144 = vector.broadcast %cst_127 : f32 to vector<4x256xf32>
    %145 = arith.cmpf oge, %143, %144 : vector<4x256xf32>
    %cst_128 = arith.constant 0.00999999977 : f32
    %146 = vector.broadcast %cst_128 : f32 to vector<4x256xf32>
    %147 = arith.mulf %146, %143 : vector<4x256xf32>
    %148 = arith.select %145, %143, %147 : vector<4x256xi1>, vector<4x256xf32>
    %c0_129 = arith.constant 0 : index
    %c0_130 = arith.constant 0 : index
    %c0_131 = arith.constant 0 : index
    %149 = vector.load %arg8[%c0_129, %c0_130, %c0_131] : memref<1x4x256xf32, #tpu.memory_space<vmem>>, vector<1x4x256xf32>
    %150 = vector.shape_cast %149 : vector<1x4x256xf32> to vector<4x256xf32>
    %151 = vector.shape_cast %148 : vector<4x256xf32> to vector<1x4x256xf32>
    tpu.vector_store %arg8[%c0_129, %c0_130, %c0_131], %151 {strides = array<i32>} : memref<1x4x256xf32, #tpu.memory_space<vmem>>, vector<1x4x256xf32>,
    return
  }
  func.func @transform_0(%arg0: i32) -> (i32, i32, i32) {
    %c0_i32 = arith.constant 0 : i32
    %c0_i32_0 = arith.constant 0 : i32
    %c0_i32_1 = arith.constant 0 : i32
    return %arg0, %c0_i32, %c0_i32_0 : i32, i32, i32
  }
  func.func @transform_1(%arg0: i32) -> (i32, i32, i32) {
    %c0_i32 = arith.constant 0 : i32
    %c0_i32_0 = arith.constant 0 : i32
    %c0_i32_1 = arith.constant 0 : i32
    return %arg0, %c0_i32, %c0_i32_0 : i32, i32, i32
  }
  func.func @transform_2(%arg0: i32) -> (i32, i32) {
    %c0_i32 = arith.constant 0 : i32
    %c0_i32_0 = arith.constant 0 : i32
    %c0_i32_1 = arith.constant 0 : i32
    return %c0_i32, %c0_i32_0 : i32, i32
  }
  func.func @transform_3(%arg0: i32) -> (i32, i32, i32) {
    %c0_i32 = arith.constant 0 : i32
    %c0_i32_0 = arith.constant 0 : i32
    %c0_i32_1 = arith.constant 0 : i32
    %c0_i32_2 = arith.constant 0 : i32
    return %c0_i32, %c0_i32_0, %c0_i32_1 : i32, i32, i32
  }
  func.func @transform_4(%arg0: i32) -> (i32, i32) {
    %c0_i32 = arith.constant 0 : i32
    %c0_i32_0 = arith.constant 0 : i32
    %c0_i32_1 = arith.constant 0 : i32
    return %c0_i32, %c0_i32_0 : i32, i32
  }
  func.func @transform_5(%arg0: i32) -> (i32, i32, i32) {
    %c0_i32 = arith.constant 0 : i32
    %c0_i32_0 = arith.constant 0 : i32
    %c0_i32_1 = arith.constant 0 : i32
    %c0_i32_2 = arith.constant 0 : i32
    return %c0_i32, %c0_i32_0, %c0_i32_1 : i32, i32, i32
  }
  func.func @transform_6(%arg0: i32) -> (i32, i32) {
    %c0_i32 = arith.constant 0 : i32
    %c0_i32_0 = arith.constant 0 : i32
    %c0_i32_1 = arith.constant 0 : i32
    return %c0_i32, %c0_i32_0 : i32, i32
  }
  func.func @transform_7(%arg0: i32) -> (i32, i32, i32) {
    %c0_i32 = arith.constant 0 : i32
    %c0_i32_0 = arith.constant 0 : i32
    %c0_i32_1 = arith.constant 0 : i32
    return %arg0, %c0_i32, %c0_i32_0 : i32, i32, i32
  }
}

</mosaic_0001>

<bundles_post_ra>
// kernel: up_forward.1
= control target key start
LH: loop header
LB: loop body
LE: loop exit
PB: predicated region body
PF: predicated region fallthrough
CT: control target
= control target key end

     0   :  { %s2389_s24 = smov 0   ;;  %s2731_s0 = inlined_call_operand.vmem [shape: f32[2,4,256], index: 0, kind: input, shape index: {}]   ;;  %s2732_s1 = inlined_call_operand.vmem [shape: f32[2,4,256], index: 1, kind: input, shape index: {}]   ;;  %s2733_s2 = inlined_call_operand.vmem [shape: f32[2,256], index: 2, kind: input, shape index: {}]   ;;  %s2734_s3 = inlined_call_operand.vmem [shape: f32[9,4,8], index: 3, kind: input, shape index: {}]   ;;  %s2735_s4 = inlined_call_operand.vmem [shape: f32[4,1], index: 4, kind: input, shape index: {}]   ;;  %s2736_s5 = inlined_call_operand.vmem [shape: f32[9,4,4], index: 5, kind: input, shape index: {}]   ;;  %s2737_s6 = inlined_call_operand.vmem [shape: f32[4,1], index: 6, kind: input, shape index: {}]   ;;  %s2738_s7 = inlined_call_operand.vmem [shape: f32[2,4,256], index: 7, kind: output, shape index: {}]  }
   0x1 LB: > { %s2228_s25 = sadd.s32 4294967295, %s2331_s24   ;;  %p2232_p0 = scmp.ge.s32.totalorder %s2331_s24, 1  ;;  %s2331_s24 = sphi %s2389_s24, %s17_s24  }
   0x2   : > { %p247_p1 = scmp.lt.s32.totalorder %s2331_s24, 3 }
   0x4   : > { %p248_p2 = pnand %p2232_p0, %p247_p1 }
   0x5   : > { %p284_p3 = scmp.lt.s32.totalorder (!%p248_p2), %s2228_s25, 1  ;;  %s2334_s10 = smov (!%p248_p2), 17  }
   0x6   : > { %251 = sbr.rel (%p248_p2) target bundleno = 1002 (0x3ea), region = 48  ;;  %s2335_s15 = smov (!%p248_p2), 2  }
   0x7   : > { %s2336_s16 = smov (!%p248_p2), 16   ;;  %s2337_s17 = smov (!%p248_p2), 18  }
   0x8   : > { %s2338_s18 = smov (!%p248_p2), 32   ;;  %s2339_s19 = smov (!%p248_p2), 34  }
   0x9   : > { %s2340_s20 = smov (!%p248_p2), 127   ;;  %s2341_s21 = smov (!%p248_p2), 111  }
   0xa   : > { %s2342_s22 = smov (!%p248_p2), 95   ;;  %s2343_s23 = smov (!%p248_p2), 126  }
   0xb   : > { %v341_v0 = vlaneseq  ;;  %vm302_vm0 = vcmask 138240   ;;  %s2752_s25 = smov (!%p284_p3, %s2228_s25), 1  ;;  %v2333_v1 = vmov 0.0   ;;  %vm304_vm1 = vcmask 277640   ;;  %v353_v36 = vld [vmem:[%s2734_s3] sm:$0xf] }
   0xc   : > { %303 = vst.msk [vmem:[#allocation2] sm:$0xff] %vm302_vm0, %v2333_v1  ;;  %439 = vmatprep.mubr.f32.mxu0 %v2333_v1  ;;  %513 = vmatprep.mubr.f32.mxu1 %v2333_v1  ;;  %vm320_vm2 = vcmask 134144   ;;  %s2401_s26 = sshll.u32 %s2752_s25, 3  ;;  %v2239_v8 = vld [vmem:[%s2733_s2 + $0x1] ss:$2 sm:$0x3] }
   0xd   : > { %v342_v2 = vshrl.u32 %v341_v0, 7  ;;  %305 = vst.msk [vmem:[#allocation2 + $0x10] sm:$0xff] %vm304_vm1, %v2333_v1  ;;  %s288_s29 = scalar_lea.vmem %s2731_s0, %s2401_s26  ;;  %s293_s9 = scalar_lea.vmem %s2732_s1, %s2401_s26  ;;  %v299_v11 = vld [vmem:[%s2733_s2] ss:$2 sm:$0x3]  ;;  %vm317_vm3 = vcmask 1043592  }
   0xe   : > { %1241 = vst.msk [vmem:[#allocation3] sm:$0xf] %vm320_vm2, %v2333_v1  ;;  %v306_v3 = vld [vmem:[%s288_s29] sm:$0xff]  ;;  %vm333_vm4 = vcmask 1047692   ;;  %vm336_vm5 = vcmask 138244   ;;  %vm371_vm6 = vcmask 64512  }
   0xf   : > { %309 = vrot.lane.b32.xlu0 %v306_v3, %s2334_s10  ;;  %v308_v4 = vcombine.high %v306_v3, %v306_v3  ;;  %v322_v5 = vld [vmem:[%s293_s9] sm:$0xff]  ;;  %v343_v6 = vsub.s32 0, %v342_v2  ;;  %v347_v9 = vsub.s32 1, %v342_v2  ;;  %s2344_s28 = smov 112   ;;  %vm533_vm7 = vcmask 15360   ;;  %s2345_s29 = smov 110  }
  0x10   : > { %v324_v7 = vcombine.low %v322_v5, %v322_v5  ;;  %vm637_vm8 = vcmask 130048   ;;  %vm830_vm9 = vcmask 146432   ;;  %s2346_s30 = smov 96   ;;  %vm934_vm10 = vcmask 261120   ;;  %s2348_s8 = smov 94  }
  0x11   : > { %v2420_v10 = vrot.slane %v2239_v8, %v343_v6  ;;  %v2426_v12 = vrot.slane %v2239_v8, %v347_v9  ;;  %v2430_v13 = vrot.slane %v299_v11, %v343_v6  ;;  %v2434_v14 = vrot.slane %v299_v11, %v347_v9  ;;  %v1227_v57 = vld [vmem:[%s2735_s4] sm:$0xf]  ;;  %v2240_v3 = vld [vmem:[%s2734_s3 + $0x4] sm:$0xf] }
  0x12   : > { %325 = vrot.lane.b32.xlu1 %v324_v7, %s2334_s10  ;;  %vm1127_vm11 = vcmask 277504   ;;  %v2347_v53 = vmov 0   ;;  %vm366_vm12 = vcmask 1039360   ;;  %vm552_vm13 = vcmask 1031168  }
  0x13   : > { %311 = vrot.lane.b32.xlu0 %v308_v4, %s2334_s10  ;;  %vm656_vm14 = vcmask 916480   ;;  %vm745_vm15 = vcmask 908288   ;;  %vm2739_vm1 = vcmask 900096  }
  0x14   : > { %2321 = vset.pattern.permute.xlu0 %v2347_v53 }
  0x16   : > { %327 = vrot.lane.b32.xlu1 %v322_v5, %s2334_s10 }
  0x17   : > { %529 = vrot.lane.b32.xlu0 %v2420_v10, %s2335_s15 }
  0x1a   : > { %531 = vrot.lane.b32.xlu1 %v2426_v12, %s2335_s15 }
  0x1b   : > { %633 = vrot.lane.b32.xlu0 %v2430_v13, %s2336_s16 }
  0x1e   : > { %635 = vrot.lane.b32.xlu1 %v2434_v14, %s2336_s16 }
  0x1f   : > { %826 = vrot.lane.b32.xlu0 %v2420_v10, %s2337_s17 }
  0x22   : > { %828 = vrot.lane.b32.xlu1 %v2426_v12, %s2337_s17 }
  0x23   : > { %930 = vrot.lane.b32.xlu0 %v2430_v13, %s2338_s18 }
  0x26   : > { %932 = vrot.lane.b32.xlu1 %v2434_v14, %s2338_s18 }
  0x27   : > { %1123 = vrot.lane.b32.xlu0 %v2420_v10, %s2339_s19 }
  0x2a   : > { %1125 = vrot.lane.b32.xlu1 %v2426_v12, %s2339_s19 }
  0x81   : > { %v310_v15 = vpop.permute.xlu0 %309 }
  0x82   : > { %318 = vst.msk [vmem:[#allocation2] sm:$0xf] %vm317_vm3, %v310_v15 }
  0x84   : > { %v326_v16 = vpop.permute.xlu1 %325 }
  0x85   : > { %334 = vst.msk [vmem:[#allocation2] sm:$0xf0] %vm333_vm4, %v326_v16  ;;  %v312_v17 = vpop.permute.xlu0 %311  ;;  %vm2740_vm4 = vcmask 777216  }
  0x86   : > { %v313_v18 = vsel %vm302_vm0, %v310_v15, %v312_v17  ;;  %321 = vst.msk [vmem:[#allocation2 + $0x10] sm:$0xf] %vm320_vm2, %v312_v17 }
  0x87   : > { %319 = vst [vmem:[#allocation2 + $0x8] sm:$0xf] %v313_v18 }
  0x88   : > { %v328_v19 = vpop.permute.xlu1 %327 }
  0x89   : > { %v329_v20 = vsel %vm302_vm0, %v326_v16, %v328_v19  ;;  %337 = vst.msk [vmem:[#allocation2 + $0x10] sm:$0xf0] %vm336_vm5, %v328_v19  ;;  %v530_v24 = vpop.permute.xlu0 %529  ;;  %vm2742_vm5 = vcmask 785408  }
  0x8a   : > { %335 = vst [vmem:[#allocation2 + $0x8] sm:$0xf0] %v329_v20 }
  0x8c   : > { %v2456_v21 = vld [vmem:[#allocation2] sm:$0xff]  ;;  %v532_v25 = vpop.permute.xlu1 %531 }
  0x8d   : > { %360 = vrot.lane.b32.xlu0 %v2456_v21, %s2340_s20  ;;  %v351_v27 = vmul.f32 %v2430_v13, %v2456_v21  ;;  %v634_v28 = vpop.permute.xlu0 %633  ;;  %v538_v30 = vmul.f32 %v530_v24, %v2456_v21  ;;  %v534_v43 = vsel %vm533_vm7, %v530_v24, %v532_v25  ;;  %v2243_v24 = vld [vmem:[%s2734_s3 + $0x8] sm:$0xf] }
  0x8e   : > { %v642_v34 = vmul.f32 %v634_v28, %v2456_v21 }
  0x90   : > { %v2460_v22 = vld [vmem:[#allocation2 + $0x10] sm:$0xff]  ;;  %v636_v29 = vpop.permute.xlu1 %635 }
  0x91   : > { %v2462_v23 = vld [vmem:[#allocation2 + $0x8] sm:$0xff]  ;;  %743 = vrot.lane.b32.xlu0 %v2460_v22, %s2341_s21  ;;  %364 = vrot.lane.b32.xlu1 %v2460_v22, %s2340_s20  ;;  %v540_v31 = vmul.f32 %v532_v25, %v2460_v22  ;;  %v827_v32 = vpop.permute.xlu0 %826  ;;  %v644_v35 = vmul.f32 %v636_v29, %v2460_v22  ;;  %v638_v44 = vsel %vm637_vm8, %v634_v28, %v636_v29 }
  0x92   : > { %v352_v26 = vmul.f32 %v2434_v14, %v2462_v23  ;;  %v835_v37 = vmul.f32 %v827_v32, %v2456_v21  ;;  %v539_v45 = vmul.f32 %v534_v43, %v2462_v23  ;;  %v643_v46 = vmul.f32 %v638_v44, %v2462_v23  ;;  %v2245_v25 = vld [vmem:[%s2734_s3 + $0xc] sm:$0xf] }
  0x94   : > { %479 = vmatprep.subr.mxu1 %v352_v26  ;;  %v829_v33 = vpop.permute.xlu1 %828 }
  0x95   : > { %739 = vrot.lane.b32.xlu1 %v2456_v21, %s2341_s21  ;;  %362 = vrot.lane.b32.xlu0 %v2462_v23, %s2340_s20  ;;  %v837_v38 = vmul.f32 %v829_v33, %v2460_v22  ;;  %v931_v39 = vpop.permute.xlu0 %930  ;;  %v831_v47 = vsel %vm830_vm9, %v827_v32, %v829_v33  ;;  %v2247_v32 = vld [vmem:[%s2734_s3 + $0x10] sm:$0xf]  ;;  %v2249_v33 = vld [vmem:[%s2734_s3 + $0x14] sm:$0xf] }
  0x96   : > { %480 = vmatpush1.msra.mxu1 %v351_v27  ;;  %v939_v41 = vmul.f32 %v931_v39, %v2456_v21  ;;  %v836_v48 = vmul.f32 %v831_v47, %v2462_v23 }
  0x97   : > { %2242 = vmatmul.mubr.msk.f32.vlgmr.msra.gmra.mxu1 %vm371_vm6, %v353_v36 }
  0x98   : > { %728 = vmatprep.mubr.f32.mxu1 %v2333_v1  ;;  %v933_v40 = vpop.permute.xlu1 %932 }
  0x99   : > { %741 = vrot.lane.b32.xlu1 %v2462_v23, %s2341_s21  ;;  %1038 = vrot.lane.b32.xlu0 %v2462_v23, %s2342_s22  ;;  %v941_v42 = vmul.f32 %v933_v40, %v2460_v22  ;;  %v935_v49 = vsel %vm934_vm10, %v931_v39, %v933_v40  ;;  %v1124_v52 = vpop.permute.xlu0 %1123  ;;  %v2251_v40 = vld [vmem:[%s2734_s3 + $0x18] sm:$0xf] }
  0x9a   : > { %v940_v51 = vmul.f32 %v935_v49, %v2462_v23  ;;  %v1132_v58 = vmul.f32 %v1124_v52, %v2456_v21 }
  0x9c   : > { %v1126_v50 = vpop.permute.xlu1 %1125 }
  0x9d   : > { %550 = vrot.lane.b32.xlu0 %v540_v31, %s2343_s23  ;;  %546 = vrot.lane.b32.xlu1 %v538_v30, %s2343_s23  ;;  %v1128_v54 = vsel %vm1127_vm11, %v1124_v52, %v1126_v50  ;;  %v1134_v56 = vmul.f32 %v1126_v50, %v2460_v22 }
  0x9e   : > { %v1133_v55 = vmul.f32 %v1128_v54, %v2462_v23 }
  0xa1   : > { %654 = vrot.lane.b32.xlu1 %v644_v35, %s2344_s28  ;;  %650 = vrot.lane.b32.xlu0 %v642_v34, %s2344_s28 }
  0xa5   : > { %847 = vrot.lane.b32.xlu1 %v837_v38, %s2345_s29  ;;  %843 = vrot.lane.b32.xlu0 %v835_v37, %s2345_s29 }
  0xa9   : > { %951 = vrot.lane.b32.xlu0 %v941_v42, %s2346_s30  ;;  %947 = vrot.lane.b32.xlu1 %v939_v41, %s2346_s30  ;;  %v2253_v41 = vld [vmem:[%s2734_s3 + $0x1c] sm:$0xf] }
  0xad   : > { %652 = vrot.lane.b32.xlu0 %v643_v46, %s2344_s28  ;;  %548 = vrot.lane.b32.xlu1 %v539_v45, %s2343_s23  ;;  %v2255_v46 = vld [vmem:[%s2734_s3 + $0x20] sm:$0xf] }
  0xb1   : > { %845 = vrot.lane.b32.xlu0 %v836_v48, %s2345_s29  ;;  %1040 = vrot.lane.b32.xlu1 %v2460_v22, %s2342_s22  ;;  %v2585_v48 = vcombine.low %v2430_v13, %v2434_v14 }
  0xb5   : > { %1036 = vrot.lane.b32.xlu0 %v2456_v21, %s2342_s22  ;;  %949 = vrot.lane.b32.xlu1 %v940_v51, %s2346_s30 }
  0xb9   : > { %1144 = vrot.lane.b32.xlu0 %v1134_v56, %s2348_s8  ;;  %1142 = vrot.lane.b32.xlu1 %v1133_v55, %s2348_s8 }
  0xbd   : > { %1140 = vrot.lane.b32.xlu1 %v1132_v58, %s2348_s8  ;;  %1230 = vperm.xlu0 %2321, %v1227_v57  }
  0xc1   : > { %1542 = vrot.lane.b32.xlu0 %v2585_v48, %s2336_s16 }
  0xc5   : > { %1843 = vrot.lane.b32.xlu0 %v2585_v48, %s2338_s18 }
  0xff   : > { %v361_v59 = vpop.permute.xlu0 %360 }
 0x103   : > { %v365_v60 = vpop.permute.xlu1 %364  ;;  %v744_v61 = vpop.permute.xlu0 %743 }
 0x107   : > { %v740_v62 = vpop.permute.xlu1 %739  ;;  %v363_v63 = vpop.permute.xlu0 %362 }
 0x108   : > { %v368_v0 = vsel %vm366_vm12, %v363_v63, %v365_v60  ;;  %v367_v2 = vsel %vm366_vm12, %v361_v59, %v363_v63 }
 0x109   : > { %405 = vmatprep.subr.mxu0 %v368_v0 }
 0x10a   : > { %406 = vmatpush1.msra.mxu0 %v367_v2 }
 0x10b   : > { %v742_v4 = vpop.permute.xlu1 %741  ;;  %v1039_v5 = vpop.permute.xlu0 %1038  ;;  %2241 = vmatmul.mubr.msk.f32.vlgmr.msra.gmra.mxu0 %vm371_vm6, %v2240_v3 }
 0x10c   : > { %624 = vmatprep.mubr.f32.mxu0 %v2333_v1  ;;  %v747_v26 = vsel %vm745_vm15, %v742_v4, %v744_v61  ;;  %v746_v27 = vsel %vm745_vm15, %v740_v62, %v742_v4 }
 0x10f   : > { %v547_v6 = vpop.permute.xlu1 %546  ;;  %v551_v7 = vpop.permute.xlu0 %550 }
 0x113   : > { %v655_v8 = vpop.permute.xlu1 %654  ;;  %v651_v9 = vpop.permute.xlu0 %650 }
 0x117   : > { %v848_v11 = vpop.permute.xlu1 %847  ;;  %v844_v15 = vpop.permute.xlu0 %843 }
 0x11b   : > { %v948_v16 = vpop.permute.xlu1 %947  ;;  %v952_v17 = vpop.permute.xlu0 %951 }
 0x11f   : > { %v549_v18 = vpop.permute.xlu1 %548  ;;  %v653_v19 = vpop.permute.xlu0 %652 }
 0x120   : > { %v553_v20 = vsel %vm552_vm13, %v547_v6, %v549_v18  ;;  %v657_v21 = vsel %vm656_vm14, %v651_v9, %v653_v19  ;;  %v554_v22 = vsel %vm552_vm13, %v549_v18, %v551_v7  ;;  %v658_v23 = vsel %vm656_vm14, %v653_v19, %v655_v8 }
 0x121   : > { %590 = vmatprep.subr.mxu0 %v554_v22  ;;  %694 = vmatprep.subr.mxu1 %v658_v23 }
 0x122   : > { %591 = vmatpush1.msra.mxu0 %v553_v20  ;;  %695 = vmatpush1.msra.mxu1 %v657_v21 }
 0x123   : > { %v1041_v28 = vpop.permute.xlu1 %1040  ;;  %2244 = vmatmul.mubr.msk.f32.vlgmr.msra.gmra.mxu0 %vm371_vm6, %v2243_v24  ;;  %783 = vmatprep.subr.mxu0 %v747_v26  ;;  %v846_v29 = vpop.permute.xlu0 %845 }
 0x124   : > { %v850_v30 = vsel %vm2739_vm1, %v844_v15, %v846_v29  ;;  %784 = vmatpush1.msra.mxu0 %v746_v27  ;;  %2246 = vmatmul.mubr.msk.f32.vlgmr.msra.gmra.mxu1 %vm371_vm6, %v2245_v25  ;;  %v851_v31 = vsel %vm2739_vm1, %v846_v29, %v848_v11  ;;  %v1044_v34 = vsel %vm2740_vm4, %v1039_v5, %v1041_v28  ;;  %vm2741_vm1 = vcmask 769024  }
 0x125   : > { %887 = vmatprep.subr.mxu1 %v851_v31  ;;  %817 = vmatprep.mubr.f32.mxu0 %v2333_v1 }
 0x126   : > { %888 = vmatpush1.msra.mxu1 %v850_v30  ;;  %921 = vmatprep.mubr.f32.mxu1 %v2333_v1  ;;  %v1438_v30 = vcombine.low %v2420_v10, %v2426_v12 }
 0x127   : > { %v950_v35 = vpop.permute.xlu1 %949  ;;  %2248 = vmatmul.mubr.msk.f32.vlgmr.msra.gmra.mxu0 %vm371_vm6, %v2247_v32  ;;  %1080 = vmatprep.subr.mxu1 %v1044_v34  ;;  %v1037_v36 = vpop.permute.xlu0 %1036 }
 0x128   : > { %v954_v37 = vsel %vm2742_vm5, %v948_v16, %v950_v35  ;;  %v1043_v38 = vsel %vm2740_vm4, %v1037_v36, %v1039_v5  ;;  %2250 = vmatmul.mubr.msk.f32.vlgmr.msra.gmra.mxu1 %vm371_vm6, %v2249_v33  ;;  %v955_v39 = vsel %vm2742_vm5, %v950_v35, %v952_v17  ;;  %1025 = vmatprep.mubr.f32.mxu0 %v2333_v1  ;;  %vm1242_vm4 = vcmask 273544  }
 0x129   : > { %991 = vmatprep.subr.mxu0 %v955_v39  ;;  %1081 = vmatpush1.msra.mxu1 %v1043_v38  ;;  %1243 = vst.msk [vmem:[#allocation3 + $0x8] sm:$0xf] %vm1242_vm4, %v2333_v1 }
 0x12a   : > { %992 = vmatpush1.msra.mxu0 %v954_v37  ;;  %1114 = vmatprep.mubr.f32.mxu1 %v2333_v1 }
 0x12b   : > { %v1143_v42 = vpop.permute.xlu1 %1142  ;;  %2252 = vmatmul.mubr.msk.f32.vlgmr.msra.gmra.mxu0 %vm371_vm6, %v2251_v40  ;;  %v1145_v43 = vpop.permute.xlu0 %1144 }
 0x12c   : > { %2254 = vmatmul.mubr.msk.f32.vlgmr.msra.gmra.mxu1 %vm371_vm6, %v2253_v41  ;;  %v1148_v44 = vsel %vm2741_vm1, %v1143_v42, %v1145_v43  ;;  %1218 = vmatprep.mubr.f32.mxu0 %v2333_v1 }
 0x12d   : > { %1184 = vmatprep.subr.mxu0 %v1148_v44  ;;  %1349 = vmatprep.mubr.f32.mxu1 %v2333_v1 }
 0x12f   : > { %v1141_v45 = vpop.permute.xlu1 %1140 }
 0x130   : > { %v1147_v47 = vsel %vm2741_vm1, %v1141_v45, %v1143_v42  ;;  %vm1253_vm1 = vcmask 1047556  }
 0x131   : > { %1185 = vmatpush1.msra.mxu0 %v1147_v47  ;;  %vm1254_vm5 = vmor %vm1253_vm1, %vm317_vm3  ;;  %vm1280_vm3 = vcmask 1043456  }
 0x132   : > { %2256 = vmatmul.mubr.msk.f32.vlgmr.msra.gmra.mxu0 %vm371_vm6, %v2255_v46 }
 0x133   : > { %1429 = vmatprep.mubr.f32.mxu0 %v2333_v1 }
 0x138   : > { %v1231_v18 = vpop.permute.xlu0 %1230 }
 0x13c   : > { %v1543_v34 = vpop.permute.xlu0 %1542 }
 0x13d   : > { %v1544_v40 = vrot.slane %v1543_v34, 4 }
 0x140   : > { %v1844_v41 = vpop.permute.xlu0 %1843 }
 0x141   : > { %v1845_v46 = vrot.slane %v1844_v41, 4 }
 0x157   : > { %v515_v50 = vpop.f32.mrf.mxu1 }
 0x159   : > { %v517_v52 = vpop.f32.mrf.mxu1 }
 0x1cb   : > { %v441_v49 = vpop.f32.mrf.mxu0 }
 0x1cc   : > { %v516_v53 = vadd.f32 %v515_v50, %v441_v49 }
 0x1cd   : > { %v443_v51 = vpop.f32.mrf.mxu0 }
 0x1ce   : > { %v518_v54 = vadd.f32 %v517_v52, %v443_v51 }
 0x1e3   : > { %v626_v55 = vpop.f32.mrf.mxu0 }
 0x1e4   : > { %v631_v56 = vadd.f32 %v626_v55, %v516_v53  ;;  %v730_v57 = vpop.f32.mrf.mxu1 }
 0x1e5   : > { %v628_v13 = vpop.f32.mrf.mxu0 }
 0x1e6   : > { %v632_v14 = vadd.f32 %v628_v13, %v518_v54  ;;  %v735_v58 = vadd.f32 %v730_v57, %v631_v56  ;;  %v732_v59 = vpop.f32.mrf.mxu1  ;;  %v1545_v56 = vsel %vm637_vm8, %v1544_v40, %v1543_v34  ;;  %v1261_v57 = vld [vmem:[%s2736_s5] sm:$0xf]  ;;  %vm2745_vm8 = vcmask 785408  }
 0x1e7   : > { %v819_v60 = vpop.f32.mrf.mxu0 }
 0x1e8   : > { %v736_v61 = vadd.f32 %v732_v59, %v632_v14  ;;  %v824_v62 = vadd.f32 %v819_v60, %v735_v58  ;;  %v923_v63 = vpop.f32.mrf.mxu1  ;;  %v1846_v58 = vsel %vm934_vm10, %v1845_v46, %v1844_v41  ;;  %v2268_v41 = vld [vmem:[%s2736_s5 + $0xc] sm:$0xf]  ;;  %vm2747_vm10 = vcmask 777216  }
 0x1e9   : > { %v821_v0 = vpop.f32.mrf.mxu0 }
 0x1ea   : > { %v825_v2 = vadd.f32 %v821_v0, %v736_v61  ;;  %v928_v3 = vadd.f32 %v923_v63, %v824_v62  ;;  %v925_v4 = vpop.f32.mrf.mxu1 }
 0x1eb   : > { %v1027_v5 = vpop.f32.mrf.mxu0 }
 0x1ec   : > { %v929_v6 = vadd.f32 %v925_v4, %v825_v2  ;;  %v1116_v7 = vpop.f32.mrf.mxu1  ;;  %v1032_v8 = vadd.f32 %v1027_v5, %v928_v3 }
 0x1ed   : > { %v1029_v9 = vpop.f32.mrf.mxu0 }
 0x1ee   : > { %v1033_v11 = vadd.f32 %v1029_v9, %v929_v6  ;;  %v1118_v15 = vpop.f32.mrf.mxu1  ;;  %v1121_v16 = vadd.f32 %v1116_v7, %v1032_v8 }
 0x1f0   : > { %v1122_v19 = vadd.f32 %v1118_v15, %v1033_v11  ;;  %v2142_v11 = vld [vmem:[%s2737_s6] sm:$0xf] }
 0x1f2   : > { %v1220_v17 = vpop.f32.mrf.mxu0 }
 0x1f3   : > { %v1225_v20 = vadd.f32 %v1220_v17, %v1121_v16 }
 0x1f4   : > { %v1222_v21 = vpop.f32.mrf.mxu0 }
 0x1f5   : > { %v1226_v22 = vadd.f32 %v1222_v21, %v1122_v19  ;;  %v1233_v23 = vadd.f32 %v1231_v18, %v1225_v20 }
 0x1f7   : > { %v1234_v24 = vadd.f32 %v1231_v18, %v1226_v22  ;;  %v1237_v25 = vmul.f32 0.01, %v1233_v23  ;;  %vm1235_vm6 = vcmp.ge.f32.partialorder %v1233_v23, 0.0 }
 0x1f9   : > { %vm1236_vm4 = vcmp.ge.f32.partialorder %v1234_v24, 0.0  ;;  %v1238_v26 = vmul.f32 0.01, %v1234_v24  ;;  %v1239_v27 = vsel %vm1235_vm6, %v1233_v23, %v1237_v25 }
 0x1fb   : > { %v1240_v28 = vsel %vm1236_vm4, %v1234_v24, %v1238_v26 }
 0x1fc   : > { %v1246_v29 = vcombine.low %v1239_v27, %v1240_v28  ;;  %v2257_v27 = vld [vmem:[%s2736_s5 + $0x4] sm:$0xf] }
 0x1fe   : > { %1247 = vrot.lane.b32.xlu1 %v1246_v29, %s2334_s10 }
 0x202   : > { %1439 = vrot.lane.b32.xlu1 %v1438_v30, %s2335_s15  ;;  %s298_s15 = scalar_lea.vmem %s2738_s7, %s2401_s26 }
 0x206   : > { %1740 = vrot.lane.b32.xlu1 %v1438_v30, %s2337_s17 }
 0x20a   : > { %2041 = vrot.lane.b32.xlu1 %v1438_v30, %s2339_s19 }
 0x270   : > { %v1248_v31 = vpop.permute.xlu1 %1247 }
 0x271   : > { %v1249_v32 = vrot.slane %v1248_v31, 4 }
 0x273   : > { %v1250_v33 = vsel %vm302_vm0, %v1249_v32, %v1248_v31  ;;  %1256 = vst.msk [vmem:[#allocation3 + $0x8] sm:$0xf] %vm320_vm2, %v1249_v32  ;;  %vm1276_vm0 = vcmask 31744   ;;  %vm2743_vm2 = vcmask 900096  }
 0x274   : > { %1255 = vst.msk [vmem:[#allocation3] sm:$0xff] %vm1254_vm5, %v1250_v33  ;;  %v1440_v35 = vpop.permute.xlu1 %1439 }
 0x275   : > { %v1441_v38 = vrot.slane %v1440_v35, 4 }
 0x277   : > { %v1442_v53 = vsel %vm533_vm7, %v1441_v38, %v1440_v35  ;;  %vm2744_vm7 = vmmov %vm2743_vm2 }
 0x278   : > { %v1741_v44 = vpop.permute.xlu1 %1740 }
 0x27a   : > { %v1644_v10 = vld [vmem:[#allocation3 + $0x8] sm:$0xf] }
 0x27b   : > { %v2601_v36 = vld [vmem:[#allocation3] sm:$0xff]  ;;  %1654 = vrot.lane.b32.xlu0 %v1644_v10, %s2341_s21  ;;  %v1262_v12 = vld [vmem:[#allocation3 + $0x8] sm:$0xf] }
 0x27c   : > { %1272 = vrot.lane.b32.xlu1 %v1262_v12, %s2340_s20  ;;  %v1260_v37 = vmul.f32 %v2601_v36, %v2585_v48  ;;  %v1437_v39 = vld [vmem:[#allocation3 + $0x8] sm:$0xf]  ;;  %v1742_v48 = vrot.slane %v1741_v44, 4  ;;  %v1649_v54 = vcombine.high %v2601_v36, %v2601_v36  ;;  %v1445_v55 = vmul.f32 %v1442_v53, %v2601_v36  ;;  %v2042_v61 = vpop.permute.xlu1 %2041 }
 0x27d   : > { %v1541_v43 = vld [vmem:[#allocation3 + $0x8] sm:$0xf]  ;;  %v1446_v45 = vmul.f32 %v1441_v38, %v1437_v39  ;;  %v1548_v13 = vmul.f32 %v1545_v56, %v2601_v36  ;;  %v1849_v60 = vmul.f32 %v1846_v58, %v2601_v36  ;;  %v2043_v63 = vrot.slane %v2042_v61, 4 }
 0x27e   : > { %v1357_v42 = vcombine.high %v1260_v37, %v1260_v37  ;;  %v1549_v47 = vmul.f32 %v1544_v40, %v1541_v43  ;;  %v1842_v49 = vld [vmem:[#allocation3 + $0x8] sm:$0xf]  ;;  %v1743_v14 = vsel %vm830_vm9, %v1742_v48, %v1741_v44  ;;  %v1451_v62 = vcombine.high %v1445_v55, %v1445_v55  ;;  %vm2746_vm9 = vmmov %vm2745_vm8 }
 0x27f   : > { %1268 = vrot.lane.b32.xlu0 %v2601_v36, %s2340_s20  ;;  %v1739_v50 = vld [vmem:[#allocation3 + $0x8] sm:$0xf]  ;;  %v1850_v51 = vmul.f32 %v1845_v46, %v1842_v49  ;;  %v1746_v59 = vmul.f32 %v1743_v14, %v2601_v36  ;;  %v1554_v0 = vcombine.high %v1548_v13, %v1548_v13  ;;  %v2044_v2 = vsel %vm1127_vm11, %v2043_v63, %v2042_v61  ;;  %v2276_v49 = vld [vmem:[%s2736_s5 + $0x14] sm:$0xf]  ;;  %vm2748_vm11 = vmmov %vm2747_vm10 }
 0x280   : > { %1650 = vrot.lane.b32.xlu1 %v2601_v36, %s2341_s21  ;;  %2261 = vmatprep.subr.msk.mxu0 %vm1280_vm3, %v1357_v42  ;;  %v1747_v52 = vmul.f32 %v1742_v48, %v1739_v50  ;;  %v1945_v3 = vld [vmem:[#allocation3 + $0x8] sm:$0xf]  ;;  %v2047_v5 = vmul.f32 %v2044_v2, %v2601_v36  ;;  %v1855_v6 = vcombine.high %v1849_v60, %v1849_v60  ;;  %v2272_v42 = vld [vmem:[%s2736_s5 + $0x10] sm:$0xf]  ;;  %v2280_v50 = vld [vmem:[%s2736_s5 + $0x18] sm:$0xf] }
 0x281   : > { %2262 = vmatpush1.msk.msra.mxu0 %vm1280_vm3, %v1260_v37  ;;  %v1752_v4 = vcombine.high %v1746_v59, %v1746_v59  ;;  %v2040_v8 = vld [vmem:[#allocation3 + $0x8] sm:$0xf] }
 0x282   : > { %2263 = vmatmul.mubr.msk.f32.vlgmr.msra.gmra.mxu0 %vm1276_vm0, %v1261_v57  ;;  %v2053_v7 = vcombine.high %v2047_v5, %v2047_v5  ;;  %v2048_v9 = vmul.f32 %v2043_v63, %v2040_v8  ;;  %v2288_v14 = vld [vmem:[%s2736_s5 + $0x20] sm:$0xf] }
 0x283   : > { %1456 = vrot.lane.b32.xlu0 %v1446_v45, %s2343_s23  ;;  %1634 = vmatprep.mubr.f32.mxu0 %v2333_v1 }
 0x284   : > { %1559 = vrot.lane.b32.xlu1 %v1549_v47, %s2344_s28 }
 0x287   : > { %1860 = vrot.lane.b32.xlu0 %v1850_v51, %s2346_s30 }
 0x288   : > { %1757 = vrot.lane.b32.xlu1 %v1747_v52, %s2345_s29 }
 0x28b   : > { %1270 = vrot.lane.b32.xlu0 %v1649_v54, %s2340_s20 }
 0x28c   : > { %1452 = vrot.lane.b32.xlu1 %v1445_v55, %s2343_s23  ;;  %v2284_v55 = vld [vmem:[%s2736_s5 + $0x1c] sm:$0xf] }
 0x28f   : > { %1555 = vrot.lane.b32.xlu0 %v1548_v13, %s2344_s28 }
 0x290   : > { %1652 = vrot.lane.b32.xlu1 %v1649_v54, %s2341_s21 }
 0x293   : > { %1753 = vrot.lane.b32.xlu0 %v1746_v59, %s2345_s29 }
 0x294   : > { %1856 = vrot.lane.b32.xlu1 %v1849_v60, %s2346_s30 }
 0x297   : > { %1953 = vrot.lane.b32.xlu0 %v1649_v54, %s2342_s22 }
 0x298   : > { %1454 = vrot.lane.b32.xlu1 %v1451_v62, %s2343_s23 }
 0x29b   : > { %1557 = vrot.lane.b32.xlu0 %v1554_v0, %s2344_s28 }
 0x29c   : > { %1955 = vrot.lane.b32.xlu1 %v1945_v3, %s2342_s22 }
 0x29f   : > { %1755 = vrot.lane.b32.xlu0 %v1752_v4, %s2345_s29 }
 0x2a0   : > { %1858 = vrot.lane.b32.xlu1 %v1855_v6, %s2346_s30 }
 0x2a3   : > { %1951 = vrot.lane.b32.xlu0 %v2601_v36, %s2342_s22  ;;  %v2264_v36 = vld [vmem:[%s2736_s5 + $0x8] sm:$0xf] }
 0x2a4   : > { %2056 = vrot.lane.b32.xlu1 %v2053_v7, %s2348_s8 }
 0x2a7   : > { %2058 = vrot.lane.b32.xlu0 %v2048_v9, %s2348_s8 }
 0x2a8   : > { %2054 = vrot.lane.b32.xlu1 %v2047_v5, %s2348_s8 }
 0x2ab   : > { %2145 = vperm.xlu0 %2321, %v2142_v11  }
 0x2ed   : > { %v1655_v15 = vpop.permute.xlu0 %1654 }
 0x2ee   : > { %v1273_v16 = vpop.permute.xlu1 %1272 }
 0x2f1   : > { %v1269_v17 = vpop.permute.xlu0 %1268 }
 0x2f2   : > { %v1651_v18 = vpop.permute.xlu1 %1650 }
 0x2f5   : > { %v1457_v19 = vpop.permute.xlu0 %1456 }
 0x2f6   : > { %v1560_v20 = vpop.permute.xlu1 %1559 }
 0x2f9   : > { %v1861_v21 = vpop.permute.xlu0 %1860 }
 0x2fa   : > { %v1758_v22 = vpop.permute.xlu1 %1757 }
 0x2fd   : > { %v1271_v23 = vpop.permute.xlu0 %1270 }
 0x2fe   : > { %v1453_v24 = vpop.permute.xlu1 %1452  ;;  %v1274_v25 = vsel %vm366_vm12, %v1269_v17, %v1271_v23  ;;  %v1275_v26 = vsel %vm366_vm12, %v1271_v23, %v1273_v16  ;;  %vm2749_vm12 = vcmask 769024  }
 0x2ff   : > { %2258 = vmatprep.subr.msk.mxu1 %vm1280_vm3, %v1275_v26 }
 0x300   : > { %2259 = vmatpush1.msk.msra.mxu1 %vm1280_vm3, %v1274_v25 }
 0x301   : > { %v1556_v28 = vpop.permute.xlu0 %1555  ;;  %2260 = vmatmul.mubr.msk.f32.vlgmr.msra.gmra.mxu1 %vm1276_vm0, %v2257_v27 }
 0x302   : > { %v1653_v29 = vpop.permute.xlu1 %1652  ;;  %1531 = vmatprep.mubr.f32.mxu1 %v2333_v1 }
 0x303   : > { %v1657_v10 = vsel %vm745_vm15, %v1653_v29, %v1655_v15  ;;  %v1656_v37 = vsel %vm745_vm15, %v1651_v18, %v1653_v29 }
 0x305   : > { %v1754_v30 = vpop.permute.xlu0 %1753 }
 0x306   : > { %v1857_v31 = vpop.permute.xlu1 %1856 }
 0x309   : > { %v1954_v32 = vpop.permute.xlu0 %1953 }
 0x30a   : > { %v1455_v33 = vpop.permute.xlu1 %1454 }
 0x30b   : > { %v1458_v34 = vsel %vm552_vm13, %v1453_v24, %v1455_v33  ;;  %v1459_v35 = vsel %vm552_vm13, %v1455_v33, %v1457_v19  ;;  %vm2750_vm13 = vmmov %vm2749_vm12 }
 0x30c   : > { %2265 = vmatprep.subr.msk.mxu1 %vm1280_vm3, %v1459_v35 }
 0x30d   : > { %2266 = vmatpush1.msk.msra.mxu1 %vm1280_vm3, %v1458_v34  ;;  %v1558_v12 = vpop.permute.xlu0 %1557 }
 0x30e   : > { %v1956_v38 = vpop.permute.xlu1 %1955  ;;  %2273 = vmatprep.subr.msk.mxu1 %vm1280_vm3, %v1657_v10  ;;  %v1561_v39 = vsel %vm656_vm14, %v1556_v28, %v1558_v12  ;;  %v1562_v40 = vsel %vm656_vm14, %v1558_v12, %v1560_v20  ;;  %2267 = vmatmul.mubr.msk.f32.vlgmr.msra.gmra.mxu1 %vm1276_vm0, %v2264_v36 }
 0x30f   : > { %2274 = vmatpush1.msk.msra.mxu1 %vm1280_vm3, %v1656_v37  ;;  %2269 = vmatprep.subr.msk.mxu0 %vm1280_vm3, %v1562_v40  ;;  %v1958_v51 = vsel %vm2747_vm10, %v1954_v32, %v1956_v38 }
 0x310   : > { %2270 = vmatpush1.msk.msra.mxu0 %vm1280_vm3, %v1561_v39  ;;  %1729 = vmatprep.mubr.f32.mxu1 %v2333_v1 }
 0x311   : > { %v1756_v43 = vpop.permute.xlu0 %1755  ;;  %2271 = vmatmul.mubr.msk.f32.vlgmr.msra.gmra.mxu0 %vm1276_vm0, %v2268_v41 }
 0x312   : > { %v1859_v44 = vpop.permute.xlu1 %1858  ;;  %v1759_v45 = vsel %vm2743_vm2, %v1754_v30, %v1756_v43  ;;  %v1760_v46 = vsel %vm2744_vm7, %v1756_v43, %v1758_v22  ;;  %2275 = vmatmul.mubr.msk.f32.vlgmr.msra.gmra.mxu1 %vm1276_vm0, %v2272_v42  ;;  %1832 = vmatprep.mubr.f32.mxu0 %v2333_v1 }
 0x313   : > { %v1862_v47 = vsel %vm2745_vm8, %v1857_v31, %v1859_v44  ;;  %v1863_v48 = vsel %vm2746_vm9, %v1859_v44, %v1861_v21  ;;  %2277 = vmatprep.subr.msk.mxu0 %vm1280_vm3, %v1760_v46  ;;  %1935 = vmatprep.mubr.f32.mxu1 %v2333_v1 }
 0x314   : > { %2281 = vmatprep.subr.msk.mxu1 %vm1280_vm3, %v1863_v48  ;;  %2278 = vmatpush1.msk.msra.mxu0 %vm1280_vm3, %v1759_v45 }
 0x315   : > { %2282 = vmatpush1.msk.msra.mxu1 %vm1280_vm3, %v1862_v47  ;;  %2285 = vmatprep.subr.msk.mxu0 %vm1280_vm3, %v1958_v51  ;;  %v1952_v52 = vpop.permute.xlu0 %1951 }
 0x316   : > { %v2057_v53 = vpop.permute.xlu1 %2056  ;;  %v1957_v54 = vsel %vm2748_vm11, %v1952_v52, %v1954_v32  ;;  %2279 = vmatmul.mubr.msk.f32.vlgmr.msra.gmra.mxu0 %vm1276_vm0, %v2276_v49  ;;  %2283 = vmatmul.mubr.msk.f32.vlgmr.msra.gmra.mxu1 %vm1276_vm0, %v2280_v50 }
 0x317   : > { %2286 = vmatpush1.msk.msra.mxu0 %vm1280_vm3, %v1957_v54  ;;  %2030 = vmatprep.mubr.f32.mxu0 %v2333_v1 }
 0x318   : > { %2133 = vmatprep.mubr.f32.mxu1 %v2333_v1 }
 0x319   : > { %v2059_v56 = vpop.permute.xlu0 %2058 }
 0x31a   : > { %v2055_v57 = vpop.permute.xlu1 %2054  ;;  %v2061_v13 = vsel %vm2749_vm12, %v2057_v53, %v2059_v56  ;;  %2287 = vmatmul.mubr.msk.f32.vlgmr.msra.gmra.mxu0 %vm1276_vm0, %v2284_v55 }
 0x31b   : > { %v2060_v58 = vsel %vm2750_vm13, %v2055_v57, %v2057_v53  ;;  %2289 = vmatprep.subr.msk.mxu1 %vm1280_vm3, %v2061_v13 }
 0x31c   : > { %2290 = vmatpush1.msk.msra.mxu1 %vm1280_vm3, %v2060_v58 }
 0x31d   : > { %2291 = vmatmul.mubr.msk.f32.vlgmr.msra.gmra.mxu1 %vm1276_vm0, %v2288_v14 }
 0x326   : > { %v2146_v31 = vpop.permute.xlu0 %2145 }
 0x342   : > { %v1431_v1 = vpop.f32.mrf.mxu0 }
 0x344   : > { %v1433_v62 = vpop.f32.mrf.mxu0 }
 0x3c1   : > { %v1351_v59 = vpop.f32.mrf.mxu1 }
 0x3c2   : > { %v1432_v61 = vadd.f32 %v1431_v1, %v1351_v59 }
 0x3c3   : > { %v1353_v60 = vpop.f32.mrf.mxu1 }
 0x3c4   : > { %v1434_v63 = vadd.f32 %v1433_v62, %v1353_v60 }
 0x3ce   : > { %v1533_v0 = vpop.f32.mrf.mxu1 }
 0x3cf   : > { %v1538_v2 = vadd.f32 %v1533_v0, %v1432_v61 }
 0x3d0   : > { %v1535_v3 = vpop.f32.mrf.mxu1 }
 0x3d1   : > { %v1636_v4 = vpop.f32.mrf.mxu0  ;;  %v1539_v5 = vadd.f32 %v1535_v3, %v1434_v63 }
 0x3d2   : > { %v1641_v6 = vadd.f32 %v1636_v4, %v1538_v2  ;;  %v1731_v7 = vpop.f32.mrf.mxu1 }
 0x3d3   : > { %v1638_v8 = vpop.f32.mrf.mxu0 }
 0x3d4   : > { %v1642_v9 = vadd.f32 %v1638_v8, %v1539_v5  ;;  %v1736_v11 = vadd.f32 %v1731_v7, %v1641_v6  ;;  %v1733_v15 = vpop.f32.mrf.mxu1 }
 0x3d6   : > { %v1737_v16 = vadd.f32 %v1733_v15, %v1642_v9  ;;  %v1834_v17 = vpop.f32.mrf.mxu0  ;;  %v1937_v18 = vpop.f32.mrf.mxu1 }
 0x3d7   : > { %v1839_v19 = vadd.f32 %v1834_v17, %v1736_v11 }
 0x3d8   : > { %v1836_v20 = vpop.f32.mrf.mxu0  ;;  %v1939_v21 = vpop.f32.mrf.mxu1 }
 0x3d9   : > { %v1840_v22 = vadd.f32 %v1836_v20, %v1737_v16  ;;  %v1942_v23 = vadd.f32 %v1937_v18, %v1839_v19 }
 0x3da   : > { %v2032_v24 = vpop.f32.mrf.mxu0 }
 0x3db   : > { %v1943_v25 = vadd.f32 %v1939_v21, %v1840_v22  ;;  %v2037_v26 = vadd.f32 %v2032_v24, %v1942_v23 }
 0x3dc   : > { %v2034_v27 = vpop.f32.mrf.mxu0 }
 0x3dd   : > { %v2135_v28 = vpop.f32.mrf.mxu1  ;;  %v2038_v29 = vadd.f32 %v2034_v27, %v1943_v25 }
 0x3de   : > { %v2140_v30 = vadd.f32 %v2135_v28, %v2037_v26 }
 0x3df   : > { %v2137_v32 = vpop.f32.mrf.mxu1 }
 0x3e0   : > { %v2148_v33 = vadd.f32 %v2146_v31, %v2140_v30  ;;  %v2141_v34 = vadd.f32 %v2137_v32, %v2038_v29 }
 0x3e2   : > { %v2152_v35 = vmul.f32 0.01, %v2148_v33  ;;  %v2149_v36 = vadd.f32 %v2146_v31, %v2141_v34  ;;  %vm2150_vm14 = vcmp.ge.f32.partialorder %v2148_v33, 0.0 }
 0x3e4   : > { %vm2151_vm15 = vcmp.ge.f32.partialorder %v2149_v36, 0.0  ;;  %v2153_v10 = vmul.f32 0.01, %v2149_v36  ;;  %v2154_v12 = vsel %vm2150_vm14, %v2148_v33, %v2152_v35 }
 0x3e6   : > { %v2155_v37 = vsel %vm2151_vm15, %v2149_v36, %v2153_v10 }
 0x3e7   : > { %v2158_v38 = vcombine.low %v2154_v12, %v2155_v37 }
 0x3e9   : > { %2160 = vst [vmem:[%s298_s15] sm:$0xff] %v2158_v38 }
 0x3ea PF: > { %s17_s24 = sadd.s32 1, %s2331_s24  }
 0x3eb   : > { %p14_p4 = scmp.ge.s32.totalorder %s17_s24, 4  }
 0x3ed   :  { %16 = sbr.rel (!%p14_p4) target bundleno = 1 (0x1), region = 98 }

</bundles_post_ra>
